<compile_context>
chip_gen: v5e
topology: v5e:2x2
jax: 0.10.0
libtpu: 0.0.40
codegen_flags: <defaults>
</compile_context>

<pallas_src>
import jax
import jax.numpy as jnp
import numpy as np
from jax.experimental import pallas as pl
from jax.experimental.pallas import tpu as pltpu


def _leaky_relu(x, slope=0.2):
    return jnp.where(x > 0, x, slope * x)


def _mlp_kernel(noise_ref, w1_ref, b1_ref, w2_ref, b2_ref, w3_ref, b3_ref, out_ref):
    # Layer 1: Linear(in_dim -> 500) + LeakyReLU(0.2)
    h = jnp.dot(noise_ref[...], w1_ref[...], preferred_element_type=jnp.float32)
    h = _leaky_relu(h + b1_ref[...])
    # Layer 2: Linear(500 -> 500) + LeakyReLU(0.2)
    h = jnp.dot(h, w2_ref[...], preferred_element_type=jnp.float32)
    h = _leaky_relu(h + b2_ref[...])
    # Layer 3: Linear(500 -> output_dim), no activation
    out = jnp.dot(h, w3_ref[...], preferred_element_type=jnp.float32) + b3_ref[...]
    out_ref[...] = out


def ts_generator_linear_forward(noise, params):
    """noise: (B, input_dim*label_dim) f32. Returns out: (B, output_dim) f32."""
    B = noise.shape[0]
    O = params["w3"].shape[1]
    args = (
        noise,
        params["w1"], params["b1"],
        params["w2"], params["b2"],
        params["w3"], params["b3"],
    )
    # Grid-less call: whole arrays resident in VMEM, no pipelining machinery.
    in_specs = [pl.BlockSpec(memory_space=pltpu.MemorySpace.VMEM) for _ in args]
    out_spec = pl.BlockSpec(memory_space=pltpu.MemorySpace.VMEM)

    return pl.pallas_call(
        _mlp_kernel,
        out_shape=jax.ShapeDtypeStruct((B, O), jnp.float32),
        in_specs=in_specs,
        out_specs=out_spec,
    )(*args)


def make_params(key, input_dim, output_dim, label_dim, hidden_dim=500):
    """Deterministic synthetic parameters matching the module's __init__ shapes.
    Weights are stored pre-transposed: (in_features, out_features); biases (1, out)."""
    in_dim = input_dim * label_dim
    H, O = hidden_dim, output_dim
    keys = jax.random.split(key, 6)

    def u(k, shape, fan_in):
        bound = 1.0 / np.sqrt(fan_in)
        return jax.random.uniform(k, shape, jnp.float32, -bound, bound)

    return {
        "w1": u(keys[0], (in_dim, H), in_dim), "b1": u(keys[1], (1, H), in_dim),
        "w2": u(keys[2], (H, H), H),           "b2": u(keys[3], (1, H), H),
        "w3": u(keys[4], (H, O), H),           "b3": u(keys[5], (1, O), H),
    }


def reference_forward(noise, p):
    """Pure-JAX reference (mirrors torch semantics) for correctness check."""
    def lrelu(x):
        return jnp.where(x > 0, x, 0.2 * x)
    h = lrelu(noise @ p["w1"] + p["b1"])
    h = lrelu(h @ p["w2"] + p["b2"])
    return h @ p["w3"] + p["b3"]


if __name__ == "__main__":
    # Small shapes consistent with the module.
    input_dim, label_dim = 4, 2          # noise dim = input_dim * label_dim = 8
    output_dim = 128                     # time_step (lane-dense output width)
    hidden_dim = 500                     # fixed by the module definition
    batch = 8

    key = jax.random.PRNGKey(0)
    k_params, k_noise = jax.random.split(key, 2)

    params = make_params(k_params, input_dim, output_dim, label_dim, hidden_dim)
    noise = jax.random.normal(k_noise, (batch, input_dim * label_dim), jnp.float32)

    out = ts_generator_linear_forward(noise, params)
    jax.block_until_ready(out)

    out_ref = reference_forward(noise, params)
    assert out.shape == (batch, output_dim)
    np.testing.assert_allclose(np.asarray(out), np.asarray(out_ref), rtol=1e-4, atol=1e-4)

    print("KERNEL_OK")
</pallas_src>

<mosaic_0001>
module attributes {stable_mosaic.version = 11 : i64} {
  func.func @_mlp_kernel(%arg0: memref<8x8xf32, #tpu.memory_space<vmem>>, %arg1: memref<8x500xf32, #tpu.memory_space<vmem>>, %arg2: memref<1x500xf32, #tpu.memory_space<vmem>>, %arg3: memref<500x500xf32, #tpu.memory_space<vmem>>, %arg4: memref<1x500xf32, #tpu.memory_space<vmem>>, %arg5: memref<500x128xf32, #tpu.memory_space<vmem>>, %arg6: memref<1x128xf32, #tpu.memory_space<vmem>>, %arg7: memref<8x128xf32, #tpu.memory_space<vmem>>) attributes {dimension_semantics = [], scalar_prefetch = 0 : i64, scratch_operands = 0 : i64, tpu.core_type = #tpu.core_type<tc>} {
    %c0 = arith.constant 0 : index
    %c0_0 = arith.constant 0 : index
    %0 = vector.load %arg0[%c0, %c0_0] : memref<8x8xf32, #tpu.memory_space<vmem>>, vector<8x8xf32>
    %c0_1 = arith.constant 0 : index
    %c0_2 = arith.constant 0 : index
    %1 = vector.load %arg1[%c0_1, %c0_2] : memref<8x500xf32, #tpu.memory_space<vmem>>, vector<8x500xf32>
    %cst = arith.constant dense<0.000000e+00> : vector<8x500xf32>
    %2 = tpu.matmul %0, %1, %cst {dimension_numbers = #tpu.dot_dimension_numbers<[1], [0], [0], [1], [0, 0, 1, 1], [], []>} : vector<8x8xf32>, vector<8x500xf32>, vector<8x500xf32> -> vector<8x500xf32>
    %c0_3 = arith.constant 0 : index
    %c0_4 = arith.constant 0 : index
    %3 = vector.load %arg2[%c0_3, %c0_4] : memref<1x500xf32, #tpu.memory_space<vmem>>, vector<1x500xf32>
    %4 = vector.broadcast %3 : vector<1x500xf32> to vector<8x500xf32>
    %5 = arith.addf %2, %4 : vector<8x500xf32>
    %cst_5 = arith.constant 0.000000e+00 : f32
    %6 = vector.broadcast %cst_5 : f32 to vector<8x500xf32>
    %7 = arith.cmpf ogt, %5, %6 : vector<8x500xf32>
    %cst_6 = arith.constant 2.000000e-01 : f32
    %8 = vector.broadcast %cst_6 : f32 to vector<8x500xf32>
    %9 = arith.mulf %8, %5 : vector<8x500xf32>
    %10 = arith.select %7, %5, %9 : vector<8x500xi1>, vector<8x500xf32>
    %c0_7 = arith.constant 0 : index
    %c0_8 = arith.constant 0 : index
    %11 = vector.load %arg3[%c0_7, %c0_8] : memref<500x500xf32, #tpu.memory_space<vmem>>, vector<500x500xf32>
    %cst_9 = arith.constant dense<0.000000e+00> : vector<8x500xf32>
    %12 = tpu.matmul %10, %11, %cst_9 {dimension_numbers = #tpu.dot_dimension_numbers<[1], [0], [0], [1], [0, 0, 1, 1], [], []>} : vector<8x500xf32>, vector<500x500xf32>, vector<8x500xf32> -> vector<8x500xf32>
    %c0_10 = arith.constant 0 : index
    %c0_11 = arith.constant 0 : index
    %13 = vector.load %arg4[%c0_10, %c0_11] : memref<1x500xf32, #tpu.memory_space<vmem>>, vector<1x500xf32>
    %14 = vector.broadcast %13 : vector<1x500xf32> to vector<8x500xf32>
    %15 = arith.addf %12, %14 : vector<8x500xf32>
    %cst_12 = arith.constant 0.000000e+00 : f32
    %16 = vector.broadcast %cst_12 : f32 to vector<8x500xf32>
    %17 = arith.cmpf ogt, %15, %16 : vector<8x500xf32>
    %cst_13 = arith.constant 2.000000e-01 : f32
    %18 = vector.broadcast %cst_13 : f32 to vector<8x500xf32>
    %19 = arith.mulf %18, %15 : vector<8x500xf32>
    %20 = arith.select %17, %15, %19 : vector<8x500xi1>, vector<8x500xf32>
    %c0_14 = arith.constant 0 : index
    %c0_15 = arith.constant 0 : index
    %21 = vector.load %arg5[%c0_14, %c0_15] : memref<500x128xf32, #tpu.memory_space<vmem>>, vector<500x128xf32>
    %cst_16 = arith.constant dense<0.000000e+00> : vector<8x128xf32>
    %22 = tpu.matmul %20, %21, %cst_16 {dimension_numbers = #tpu.dot_dimension_numbers<[1], [0], [0], [1], [0, 0, 1, 1], [], []>} : vector<8x500xf32>, vector<500x128xf32>, vector<8x128xf32> -> vector<8x128xf32>
    %c0_17 = arith.constant 0 : index
    %c0_18 = arith.constant 0 : index
    %23 = vector.load %arg6[%c0_17, %c0_18] : memref<1x128xf32, #tpu.memory_space<vmem>>, vector<1x128xf32>
    %24 = vector.broadcast %23 : vector<1x128xf32> to vector<8x128xf32>
    %25 = arith.addf %22, %24 : vector<8x128xf32>
    %c0_19 = arith.constant 0 : index
    %c0_20 = arith.constant 0 : index
    %26 = vector.load %arg7[%c0_19, %c0_20] : memref<8x128xf32, #tpu.memory_space<vmem>>, vector<8x128xf32>
    tpu.vector_store %arg7[%c0_19, %c0_20], %25 {strides = array<i32>} : memref<8x128xf32, #tpu.memory_space<vmem>>, vector<8x128xf32>,
    return
  }
}

</mosaic_0001>

<bundles_post_ra>
// kernel: tpu_custom_call.1
= control target key start
LH: loop header
LB: loop body
LE: loop exit
PB: predicated region body
PF: predicated region fallthrough
CT: control target
= control target key end

     0   :  { %12 = vsyncpa [#allocation3], 0  ;;  %s1328_s0 = inlined_call_operand.hbm [shape: f32[8,8], index: 0, kind: input, shape index: {}]   ;;  %s1329_s1 = inlined_call_operand.hbm [shape: f32[8,500], index: 1, kind: input, shape index: {}]   ;;  %s1330_s2 = inlined_call_operand.hbm [shape: f32[1,500], index: 2, kind: input, shape index: {}]   ;;  %s1331_s3 = inlined_call_operand.hbm [shape: f32[500,500], index: 3, kind: input, shape index: {}]   ;;  %s1332_s4 = inlined_call_operand.hbm [shape: f32[1,500], index: 4, kind: input, shape index: {}]   ;;  %s1333_s5 = inlined_call_operand.hbm [shape: f32[500,128], index: 5, kind: input, shape index: {}]   ;;  %s1334_s6 = inlined_call_operand.vmem [shape: f32[1,128], index: 6, kind: input, shape index: {}]   ;;  %s1335_s7 = inlined_call_operand.hbm [shape: f32[8,128], index: 7, kind: output, shape index: {}]  }
   0x1   :  { %13 = vsyncpa [#allocation6], 0 }
   0x2   :  { %14 = vsyncpa [#allocation9], 0 }
   0x3   :  { %15 = vsyncpa [#allocation12], 0  ;;  %s33_s26 = sshll.u32 %s1329_s1, 4  ;;  %s34_s26 = int_to_ptr.hbm [resolvable:$true] %s33_s26 }
   0x4   :  { %16 = vsyncpa [#allocation4], 0  ;;  %s1213_s27 = smov [#allocation5]   ;;  %s54_s8 = sshll.u32 %s1331_s3, 4  ;;  %s55_s8 = int_to_ptr.hbm [resolvable:$true] %s54_s8 }
   0x5   :  { %s35_s28 = sshll.u32 %s1213_s27, 4  ;;  %s1214_s9 = smov [#allocation8]   ;;  %s36_s28 = int_to_ptr.vmem [resolvable:$true] %s35_s28 }
   0x6   :  { %38 = dma.hbm_to_vmem [thread:$0]  %s34_s26, 512, %s36_s28, [#allocation6]  }
   0x7   :  { %s56_s10 = sshll.u32 %s1214_s9, 4  ;;  %s1215_s11 = smov 512   ;;  %s57_s10 = int_to_ptr.vmem [resolvable:$true] %s56_s10 }
   0x8   :  { %s1216_s12 = smov 32   ;;  %s22_s1 = sshll.u32 %s1328_s0, 4  ;;  %s23_s1 = int_to_ptr.hbm [resolvable:$true] %s22_s1 }
   0x9   :  { %62 = dma.hbm_to_vmem [thread:$0]  %s55_s8, 32256, %s57_s10, [#allocation9], %s1215_s11, %s1215_s11, %s1216_s12  }
   0xa   :  { %s1217_s15 = smov [#allocation2]   ;;  %s44_s3 = sshll.u32 %s1330_s2, 4  ;;  %s45_s3 = int_to_ptr.hbm [resolvable:$true] %s44_s3 }
   0xb   :  { %s24_s16 = sshll.u32 %s1217_s15, 4  ;;  %s1218_s19 = smov [#allocation7]   ;;  %s25_s16 = int_to_ptr.vmem [resolvable:$true] %s24_s16 }
   0xc   :  { %27 = dma.hbm_to_vmem [thread:$0]  %s23_s1, 128, %s25_s16, [#allocation3]  }
   0xd   :  { %s46_s20 = sshll.u32 %s1218_s19, 4  ;;  %s68_s23 = sshll.u32 %s1332_s4, 4  ;;  %s47_s20 = int_to_ptr.vmem [resolvable:$true] %s46_s20  ;;  %s69_s23 = int_to_ptr.hbm [resolvable:$true] %s68_s23 }
   0xe   :  { %49 = dma.hbm_to_vmem [thread:$0]  %s45_s3, 64, %s47_s20, [#allocation6]  }
   0xf   :  { %s78_s25 = sshll.u32 %s1333_s5, 4  ;;  %s1219_s26 = smov [#allocation10]   ;;  %s79_s25 = int_to_ptr.hbm [resolvable:$true] %s78_s25 }
  0x10   :  { %s70_s27 = sshll.u32 %s1219_s26, 4  ;;  %s1220_s2 = smov [#allocation11]   ;;  %s71_s27 = int_to_ptr.vmem [resolvable:$true] %s70_s27 }
  0x11   :  { %73 = dma.hbm_to_vmem [thread:$0]  %s69_s23, 64, %s71_s27, [#allocation9]  }
  0x12   :  { %s80_s28 = sshll.u32 %s1220_s2, 4  ;;  %s1221_s29 = smov 128   ;;  %s81_s28 = int_to_ptr.vmem [resolvable:$true] %s80_s28 }
  0x13   :  { %s1222_s30 = smov 8  }
  0x14   :  { %86 = dma.hbm_to_vmem [thread:$0]  %s79_s25, 8064, %s81_s28, [#allocation12], %s1221_s29, %s1221_s29, %s1222_s30  }
  0x15   :  { %1203 = dma.done.wait [#allocation3], 128  }
  0x16   :  { %1204 = vsyncadd [#allocation3], 4294967168 }
  0x17   :  { %1205 = dma.done.wait [#allocation6], 576  }
  0x18   :  { %1206 = vsyncadd [#allocation6], 4294966720 }
  0x19   :  { %1207 = dma.done.wait [#allocation9], 32320  }
  0x1a   :  { %1208 = vsyncadd [#allocation9], 4294934976 }
  0x1b   :  { %1209 = dma.done.wait [#allocation12], 8064  }
  0x1c   :  { %1210 = vsyncadd [#allocation12], 4294959232  ;;  %v114_v0 = vld [vmem:[#allocation5] sm:$0xff]  ;;  %v115_v1 = vld [vmem:[#allocation5 + $0x8] sm:$0xff]  ;;  %vm128_vm0 = vcmask 64512   ;;  %vm490_vm1 = vcmask 1043456  }
  0x1d   :  { %v116_v2 = vld [vmem:[#allocation5 + $0x10] sm:$0xff]  ;;  %147 = vmatpush.msra.mxu0 %v114_v0  ;;  %167 = vmatpush.msra.mxu1 %v115_v1  ;;  %v117_v3 = vld [vmem:[#allocation5 + $0x18] sm:$0xff]  ;;  %v284_v5 = vld [vmem:[#allocation8 + $0x1e0] sm:$0xff]  ;;  %vm486_vm4 = vcmask 949248   ;;  %s1223_s8 = smov [#allocation13]   ;;  %s996_s12 = sshll.u32 %s1335_s7, 4  ;;  %s997_s12 = int_to_ptr.hbm [resolvable:$true] %s996_s12 }
  0x1e   :  { %v113_v4 = vld [vmem:[#allocation2] sm:$0xff]  ;;  %187 = vmatpush.msra.mxu2 %v116_v2  ;;  %207 = vmatpush.msra.mxu3 %v117_v3  ;;  %v348_v6 = vld [vmem:[#allocation8 + $0x3e0] sm:$0xff]  ;;  %v349_v3 = vld [vmem:[#allocation8 + $0x3e8] sm:$0xff]  ;;  %s994_s9 = sshll.u32 %s1223_s8, 4  ;;  %s995_s9 = int_to_ptr.vmem [resolvable:$true] %s994_s9 }
  0x1f   :  { %1009 = vmatmul.msk.f32.vlgmr.msra.gmra.mxu0 %vm128_vm0, %v113_v4  ;;  %1010 = vmatmul.msk.f32.vlgmr.msra.gmra.mxu1 %vm128_vm0, %v113_v4  ;;  %v280_v7 = vld [vmem:[#allocation8 + $0x1c0] sm:$0xff] }
  0x20   :  { %1011 = vmatmul.msk.f32.vlgmr.msra.gmra.mxu2 %vm128_vm0, %v113_v4  ;;  %1012 = vmatmul.msk.f32.vlgmr.msra.gmra.mxu3 %vm128_vm0, %v113_v4  ;;  %v344_v8 = vld [vmem:[#allocation8 + $0x3c0] sm:$0xff]  ;;  %v413_v4 = vld [vmem:[#allocation8 + $0x5e8] sm:$0xff] }
  0x21   :  { %503 = vmatpush.msrb.mxu0 %v284_v5  ;;  %523 = vmatpush.msrb.mxu1 %v348_v6  ;;  %v276_v9 = vld [vmem:[#allocation8 + $0x1a0] sm:$0xff]  ;;  %v285_v5 = vld [vmem:[#allocation8 + $0x1e8] sm:$0xff] }
  0x22   :  { %v412_v10 = vld [vmem:[#allocation8 + $0x5e0] sm:$0xff] }
  0x23   :  { %v472_v11 = vld [vmem:[#allocation8 + $0x7c0] sm:$0xf]  ;;  %543 = vmatpush.msrb.mxu2 %v412_v10  ;;  %504 = vmatpush.msrb.mxu0 %v280_v7  ;;  %v345_v7 = vld [vmem:[#allocation8 + $0x3c8] sm:$0xff] }
  0x24   :  { %v340_v12 = vld [vmem:[#allocation8 + $0x3a0] sm:$0xff]  ;;  %1013 = vmatpush.msk.msrb.mxu3 %vm490_vm1, %v472_v11  ;;  %524 = vmatpush.msrb.mxu1 %v344_v8  ;;  %v409_v8 = vld [vmem:[#allocation8 + $0x5c8] sm:$0xff] }
  0x25   :  { %v408_v13 = vld [vmem:[#allocation8 + $0x5c0] sm:$0xff]  ;;  %505 = vmatpush.msrb.mxu0 %v276_v9  ;;  %v281_v9 = vld [vmem:[#allocation8 + $0x1c8] sm:$0xff] }
  0x26   :  { %v468_v14 = vld [vmem:[#allocation8 + $0x7a0] sm:$0xff]  ;;  %544 = vmatpush.msrb.mxu2 %v408_v13  ;;  %525 = vmatpush.msrb.mxu1 %v340_v12  ;;  %v473_v10 = vld [vmem:[#allocation8 + $0x7c8] sm:$0xf] }
  0x27   :  { %v404_v15 = vld [vmem:[#allocation8 + $0x5a0] sm:$0xff]  ;;  %565 = vmatpush.msrb.mxu3 %v468_v14  ;;  %v341_v11 = vld [vmem:[#allocation8 + $0x3a8] sm:$0xff] }
  0x28   :  { %v272_v16 = vld [vmem:[#allocation8 + $0x180] sm:$0xff]  ;;  %545 = vmatpush.msrb.mxu2 %v404_v15  ;;  %v405_v12 = vld [vmem:[#allocation8 + $0x5a8] sm:$0xff] }
  0x29   :  { %v336_v17 = vld [vmem:[#allocation8 + $0x380] sm:$0xff]  ;;  %506 = vmatpush.msrb.mxu0 %v272_v16  ;;  %v277_v13 = vld [vmem:[#allocation8 + $0x1a8] sm:$0xff] }
  0x2a   :  { %v464_v18 = vld [vmem:[#allocation8 + $0x780] sm:$0xff]  ;;  %526 = vmatpush.msrb.mxu1 %v336_v17  ;;  %v469_v14 = vld [vmem:[#allocation8 + $0x7a8] sm:$0xff] }
  0x2b   :  { %v400_v19 = vld [vmem:[#allocation8 + $0x580] sm:$0xff]  ;;  %566 = vmatpush.msrb.mxu3 %v464_v18  ;;  %v337_v15 = vld [vmem:[#allocation8 + $0x388] sm:$0xff] }
  0x2c   :  { %v460_v20 = vld [vmem:[#allocation8 + $0x760] sm:$0xff]  ;;  %546 = vmatpush.msrb.mxu2 %v400_v19  ;;  %v401_v16 = vld [vmem:[#allocation8 + $0x588] sm:$0xff] }
  0x2d   :  { %v268_v21 = vld [vmem:[#allocation8 + $0x160] sm:$0xff]  ;;  %567 = vmatpush.msrb.mxu3 %v460_v20  ;;  %v273_v17 = vld [vmem:[#allocation8 + $0x188] sm:$0xff] }
  0x2e   :  { %v332_v22 = vld [vmem:[#allocation8 + $0x360] sm:$0xff]  ;;  %507 = vmatpush.msrb.mxu0 %v268_v21  ;;  %v465_v18 = vld [vmem:[#allocation8 + $0x788] sm:$0xff] }
  0x2f   :  { %v396_v23 = vld [vmem:[#allocation8 + $0x560] sm:$0xff]  ;;  %527 = vmatpush.msrb.mxu1 %v332_v22  ;;  %v333_v19 = vld [vmem:[#allocation8 + $0x368] sm:$0xff] }
  0x30   :  { %v456_v24 = vld [vmem:[#allocation8 + $0x740] sm:$0xff]  ;;  %547 = vmatpush.msrb.mxu2 %v396_v23  ;;  %v397_v20 = vld [vmem:[#allocation8 + $0x568] sm:$0xff] }
  0x31   :  { %v264_v25 = vld [vmem:[#allocation8 + $0x140] sm:$0xff]  ;;  %568 = vmatpush.msrb.mxu3 %v456_v24  ;;  %v269_v21 = vld [vmem:[#allocation8 + $0x168] sm:$0xff] }
  0x32   :  { %v328_v26 = vld [vmem:[#allocation8 + $0x340] sm:$0xff]  ;;  %508 = vmatpush.msrb.mxu0 %v264_v25  ;;  %v461_v22 = vld [vmem:[#allocation8 + $0x768] sm:$0xff] }
  0x33   :  { %v392_v27 = vld [vmem:[#allocation8 + $0x540] sm:$0xff]  ;;  %528 = vmatpush.msrb.mxu1 %v328_v26  ;;  %v329_v23 = vld [vmem:[#allocation8 + $0x348] sm:$0xff] }
  0x34   :  { %v452_v28 = vld [vmem:[#allocation8 + $0x720] sm:$0xff]  ;;  %548 = vmatpush.msrb.mxu2 %v392_v27  ;;  %v393_v24 = vld [vmem:[#allocation8 + $0x548] sm:$0xff] }
  0x35   :  { %v260_v29 = vld [vmem:[#allocation8 + $0x120] sm:$0xff]  ;;  %569 = vmatpush.msrb.mxu3 %v452_v28  ;;  %v265_v25 = vld [vmem:[#allocation8 + $0x148] sm:$0xff] }
  0x36   :  { %v324_v30 = vld [vmem:[#allocation8 + $0x320] sm:$0xff]  ;;  %509 = vmatpush.msrb.mxu0 %v260_v29  ;;  %v457_v26 = vld [vmem:[#allocation8 + $0x748] sm:$0xff] }
  0x37   :  { %v388_v31 = vld [vmem:[#allocation8 + $0x520] sm:$0xff]  ;;  %529 = vmatpush.msrb.mxu1 %v324_v30  ;;  %v325_v27 = vld [vmem:[#allocation8 + $0x328] sm:$0xff] }
  0x38   :  { %v448_v32 = vld [vmem:[#allocation8 + $0x700] sm:$0xff]  ;;  %549 = vmatpush.msrb.mxu2 %v388_v31  ;;  %v389_v28 = vld [vmem:[#allocation8 + $0x528] sm:$0xff] }
  0x39   :  { %v256_v33 = vld [vmem:[#allocation8 + $0x100] sm:$0xff]  ;;  %570 = vmatpush.msrb.mxu3 %v448_v32  ;;  %v261_v29 = vld [vmem:[#allocation8 + $0x128] sm:$0xff] }
  0x3a   :  { %v320_v34 = vld [vmem:[#allocation8 + $0x300] sm:$0xff]  ;;  %510 = vmatpush.msrb.mxu0 %v256_v33  ;;  %v453_v30 = vld [vmem:[#allocation8 + $0x728] sm:$0xff] }
  0x3b   :  { %v384_v35 = vld [vmem:[#allocation8 + $0x500] sm:$0xff]  ;;  %530 = vmatpush.msrb.mxu1 %v320_v34  ;;  %v321_v31 = vld [vmem:[#allocation8 + $0x308] sm:$0xff] }
  0x3c   :  { %v444_v36 = vld [vmem:[#allocation8 + $0x6e0] sm:$0xff]  ;;  %550 = vmatpush.msrb.mxu2 %v384_v35  ;;  %v385_v32 = vld [vmem:[#allocation8 + $0x508] sm:$0xff] }
  0x3d   :  { %v252_v37 = vld [vmem:[#allocation8 + $0xe0] sm:$0xff]  ;;  %571 = vmatpush.msrb.mxu3 %v444_v36  ;;  %v257_v33 = vld [vmem:[#allocation8 + $0x108] sm:$0xff] }
  0x3e   :  { %v316_v38 = vld [vmem:[#allocation8 + $0x2e0] sm:$0xff]  ;;  %511 = vmatpush.msrb.mxu0 %v252_v37  ;;  %v449_v34 = vld [vmem:[#allocation8 + $0x708] sm:$0xff] }
  0x3f   :  { %v380_v39 = vld [vmem:[#allocation8 + $0x4e0] sm:$0xff]  ;;  %531 = vmatpush.msrb.mxu1 %v316_v38  ;;  %v317_v35 = vld [vmem:[#allocation8 + $0x2e8] sm:$0xff] }
  0x40   :  { %v440_v40 = vld [vmem:[#allocation8 + $0x6c0] sm:$0xff]  ;;  %551 = vmatpush.msrb.mxu2 %v380_v39  ;;  %v381_v36 = vld [vmem:[#allocation8 + $0x4e8] sm:$0xff] }
  0x41   :  { %v248_v41 = vld [vmem:[#allocation8 + $0xc0] sm:$0xff]  ;;  %572 = vmatpush.msrb.mxu3 %v440_v40  ;;  %v253_v37 = vld [vmem:[#allocation8 + $0xe8] sm:$0xff] }
  0x42   :  { %v312_v42 = vld [vmem:[#allocation8 + $0x2c0] sm:$0xff]  ;;  %512 = vmatpush.msrb.mxu0 %v248_v41  ;;  %v445_v38 = vld [vmem:[#allocation8 + $0x6e8] sm:$0xff] }
  0x43   :  { %v376_v43 = vld [vmem:[#allocation8 + $0x4c0] sm:$0xff]  ;;  %532 = vmatpush.msrb.mxu1 %v312_v42  ;;  %v313_v39 = vld [vmem:[#allocation8 + $0x2c8] sm:$0xff] }
  0x44   :  { %v436_v44 = vld [vmem:[#allocation8 + $0x6a0] sm:$0xff]  ;;  %552 = vmatpush.msrb.mxu2 %v376_v43  ;;  %v377_v40 = vld [vmem:[#allocation8 + $0x4c8] sm:$0xff] }
  0x45   :  { %v244_v45 = vld [vmem:[#allocation8 + $0xa0] sm:$0xff]  ;;  %573 = vmatpush.msrb.mxu3 %v436_v44  ;;  %v249_v41 = vld [vmem:[#allocation8 + $0xc8] sm:$0xff] }
  0x46   :  { %v308_v46 = vld [vmem:[#allocation8 + $0x2a0] sm:$0xff]  ;;  %513 = vmatpush.msrb.mxu0 %v244_v45  ;;  %v441_v42 = vld [vmem:[#allocation8 + $0x6c8] sm:$0xff] }
  0x47   :  { %v372_v47 = vld [vmem:[#allocation8 + $0x4a0] sm:$0xff]  ;;  %533 = vmatpush.msrb.mxu1 %v308_v46  ;;  %v309_v43 = vld [vmem:[#allocation8 + $0x2a8] sm:$0xff] }
  0x48   :  { %v432_v48 = vld [vmem:[#allocation8 + $0x680] sm:$0xff]  ;;  %553 = vmatpush.msrb.mxu2 %v372_v47  ;;  %v373_v44 = vld [vmem:[#allocation8 + $0x4a8] sm:$0xff] }
  0x49   :  { %v240_v49 = vld [vmem:[#allocation8 + $0x80] sm:$0xff]  ;;  %574 = vmatpush.msrb.mxu3 %v432_v48  ;;  %v305_v45 = vld [vmem:[#allocation8 + $0x288] sm:$0xff] }
  0x4a   :  { %v304_v50 = vld [vmem:[#allocation8 + $0x280] sm:$0xff]  ;;  %514 = vmatpush.msrb.mxu0 %v240_v49  ;;  %v369_v46 = vld [vmem:[#allocation8 + $0x488] sm:$0xff] }
  0x4b   :  { %v368_v51 = vld [vmem:[#allocation8 + $0x480] sm:$0xff]  ;;  %534 = vmatpush.msrb.mxu1 %v304_v50  ;;  %v301_v47 = vld [vmem:[#allocation8 + $0x268] sm:$0xff] }
  0x4c   :  { %v428_v52 = vld [vmem:[#allocation8 + $0x660] sm:$0xff]  ;;  %554 = vmatpush.msrb.mxu2 %v368_v51  ;;  %v365_v48 = vld [vmem:[#allocation8 + $0x468] sm:$0xff] }
  0x4d   :  { %v236_v53 = vld [vmem:[#allocation8 + $0x60] sm:$0xff]  ;;  %575 = vmatpush.msrb.mxu3 %v428_v52  ;;  %v245_v49 = vld [vmem:[#allocation8 + $0xa8] sm:$0xff] }
  0x4e   :  { %v300_v54 = vld [vmem:[#allocation8 + $0x260] sm:$0xff]  ;;  %515 = vmatpush.msrb.mxu0 %v236_v53  ;;  %v297_v50 = vld [vmem:[#allocation8 + $0x248] sm:$0xff] }
  0x4f   :  { %v364_v55 = vld [vmem:[#allocation8 + $0x460] sm:$0xff]  ;;  %535 = vmatpush.msrb.mxu1 %v300_v54  ;;  %v361_v51 = vld [vmem:[#allocation8 + $0x448] sm:$0xff] }
  0x50   :  { %v424_v56 = vld [vmem:[#allocation8 + $0x640] sm:$0xff]  ;;  %555 = vmatpush.msrb.mxu2 %v364_v55  ;;  %v437_v52 = vld [vmem:[#allocation8 + $0x6a8] sm:$0xff] }
  0x51   :  { %v232_v57 = vld [vmem:[#allocation8 + $0x40] sm:$0xff]  ;;  %576 = vmatpush.msrb.mxu3 %v424_v56  ;;  %v241_v53 = vld [vmem:[#allocation8 + $0x88] sm:$0xff] }
  0x52   :  { %v296_v58 = vld [vmem:[#allocation8 + $0x240] sm:$0xff]  ;;  %516 = vmatpush.msrb.mxu0 %v232_v57  ;;  %v293_v54 = vld [vmem:[#allocation8 + $0x228] sm:$0xff] }
  0x53   :  { %v360_v59 = vld [vmem:[#allocation8 + $0x440] sm:$0xff]  ;;  %536 = vmatpush.msrb.mxu1 %v296_v58  ;;  %v357_v55 = vld [vmem:[#allocation8 + $0x428] sm:$0xff] }
  0x54   :  { %v420_v60 = vld [vmem:[#allocation8 + $0x620] sm:$0xff]  ;;  %556 = vmatpush.msrb.mxu2 %v360_v59  ;;  %v433_v56 = vld [vmem:[#allocation8 + $0x688] sm:$0xff] }
  0x55   :  { %v228_v61 = vld [vmem:[#allocation8 + $0x20] sm:$0xff]  ;;  %577 = vmatpush.msrb.mxu3 %v420_v60  ;;  %v237_v57 = vld [vmem:[#allocation8 + $0x68] sm:$0xff] }
  0x56   :  { %v292_v62 = vld [vmem:[#allocation8 + $0x220] sm:$0xff]  ;;  %517 = vmatpush.msrb.mxu0 %v228_v61  ;;  %v289_v58 = vld [vmem:[#allocation8 + $0x208] sm:$0xff] }
  0x57   :  { %v356_v63 = vld [vmem:[#allocation8 + $0x420] sm:$0xff]  ;;  %537 = vmatpush.msrb.mxu1 %v292_v62  ;;  %v353_v59 = vld [vmem:[#allocation8 + $0x408] sm:$0xff] }
  0x58   :  { %v416_v0 = vld [vmem:[#allocation8 + $0x600] sm:$0xff]  ;;  %557 = vmatpush.msrb.mxu2 %v356_v63  ;;  %v429_v60 = vld [vmem:[#allocation8 + $0x668] sm:$0xff] }
  0x59   :  { %v224_v1 = vld [vmem:[#allocation8] sm:$0xff]  ;;  %578 = vmatpush.msrb.mxu3 %v416_v0  ;;  %v233_v61 = vld [vmem:[#allocation8 + $0x48] sm:$0xff] }
  0x5a   :  { %v288_v2 = vld [vmem:[#allocation8 + $0x200] sm:$0xff]  ;;  %518 = vmatpush.msrb.mxu0 %v224_v1  ;;  %v425_v62 = vld [vmem:[#allocation8 + $0x648] sm:$0xff] }
  0x5b   :  { %v352_v6 = vld [vmem:[#allocation8 + $0x400] sm:$0xff]  ;;  %538 = vmatpush.msrb.mxu1 %v288_v2  ;;  %583 = vmatpush.msra.mxu3 %v285_v5  ;;  %v229_v63 = vld [vmem:[#allocation8 + $0x28] sm:$0xff] }
  0x5c   :  { %603 = vmatpush.msra.mxu0 %v349_v3  ;;  %558 = vmatpush.msrb.mxu2 %v352_v6  ;;  %v421_v0 = vld [vmem:[#allocation8 + $0x628] sm:$0xff]  ;;  %v118_v3 = vld [vmem:[#allocation7] sm:$0xf] }
  0x5d   :  { %623 = vmatpush.msra.mxu1 %v413_v4  ;;  %584 = vmatpush.msra.mxu3 %v281_v9  ;;  %v225_v1 = vld [vmem:[#allocation8 + $0x8] sm:$0xff]  ;;  %v120_v4 = vperm.slane %v118_v3, 0  ;;  %v121_v5 = vperm.slane %v118_v3, 1 }
  0x5e   :  { %604 = vmatpush.msra.mxu0 %v345_v7  ;;  %1015 = vmatpush.msk.msra.mxu2 %vm490_vm1, %v473_v10  ;;  %v417_v2 = vld [vmem:[#allocation8 + $0x608] sm:$0xff] }
  0x5f   :  { %624 = vmatpush.msra.mxu1 %v409_v8  ;;  %585 = vmatpush.msra.mxu3 %v277_v13  ;;  %v123_v13 = vperm.slane %v118_v3, 3 }
  0x60   :  { %605 = vmatpush.msra.mxu0 %v341_v11  ;;  %645 = vmatpush.msra.mxu2 %v469_v14  ;;  %v414_v14 = vld [vmem:[#allocation8 + $0x5f0] sm:$0xff] }
  0x61   :  { %625 = vmatpush.msra.mxu1 %v405_v12  ;;  %586 = vmatpush.msra.mxu3 %v273_v17  ;;  %v122_v12 = vperm.slane %v118_v3, 2  ;;  %v314_v3 = vld [vmem:[#allocation8 + $0x2d0] sm:$0xff] }
  0x62   :  { %606 = vmatpush.msra.mxu0 %v337_v15  ;;  %646 = vmatpush.msra.mxu2 %v465_v18  ;;  %v474_v15 = vld [vmem:[#allocation8 + $0x7d0] sm:$0xf] }
  0x63   :  { %626 = vmatpush.msra.mxu1 %v401_v16  ;;  %587 = vmatpush.msra.mxu3 %v269_v21  ;;  %v410_v18 = vld [vmem:[#allocation8 + $0x5d0] sm:$0xff] }
  0x64   :  { %607 = vmatpush.msra.mxu0 %v333_v19  ;;  %647 = vmatpush.msra.mxu2 %v461_v22  ;;  %v470_v19 = vld [vmem:[#allocation8 + $0x7b0] sm:$0xff] }
  0x65   :  { %627 = vmatpush.msra.mxu1 %v397_v20  ;;  %588 = vmatpush.msra.mxu3 %v265_v25  ;;  %v466_v25 = vld [vmem:[#allocation8 + $0x790] sm:$0xff] }
  0x66   :  { %608 = vmatpush.msra.mxu0 %v329_v23  ;;  %648 = vmatpush.msra.mxu2 %v457_v26 }
  0x67   :  { %628 = vmatpush.msra.mxu1 %v393_v24  ;;  %589 = vmatpush.msra.mxu3 %v261_v29  ;;  %v406_v24 = vld [vmem:[#allocation8 + $0x5b0] sm:$0xff] }
  0x68   :  { %609 = vmatpush.msra.mxu0 %v325_v27  ;;  %649 = vmatpush.msra.mxu2 %v453_v30  ;;  %v350_v29 = vld [vmem:[#allocation8 + $0x3f0] sm:$0xff] }
  0x69   :  { %629 = vmatpush.msra.mxu1 %v389_v28  ;;  %590 = vmatpush.msra.mxu3 %v257_v33  ;;  %v286_v28 = vld [vmem:[#allocation8 + $0x1f0] sm:$0xff] }
  0x6a   :  { %610 = vmatpush.msra.mxu0 %v321_v31  ;;  %650 = vmatpush.msra.mxu2 %v449_v34  ;;  %v462_v33 = vld [vmem:[#allocation8 + $0x770] sm:$0xff] }
  0x6b   :  { %630 = vmatpush.msra.mxu1 %v385_v32  ;;  %591 = vmatpush.msra.mxu3 %v253_v37  ;;  %v402_v32 = vld [vmem:[#allocation8 + $0x590] sm:$0xff] }
  0x6c   :  { %611 = vmatpush.msra.mxu0 %v317_v35  ;;  %651 = vmatpush.msra.mxu2 %v445_v38  ;;  %v282_v34 = vld [vmem:[#allocation8 + $0x1d0] sm:$0xff] }
  0x6d   :  { %631 = vmatpush.msra.mxu1 %v381_v36  ;;  %592 = vmatpush.msra.mxu3 %v249_v41  ;;  %v346_v35 = vld [vmem:[#allocation8 + $0x3d0] sm:$0xff] }
  0x6e   :  { %612 = vmatpush.msra.mxu0 %v313_v39  ;;  %652 = vmatpush.msra.mxu2 %v441_v42  ;;  %v398_v36 = vld [vmem:[#allocation8 + $0x570] sm:$0xff] }
  0x6f   :  { %632 = vmatpush.msra.mxu1 %v377_v40  ;;  %593 = vmatpush.msra.mxu3 %v245_v49  ;;  %v458_v37 = vld [vmem:[#allocation8 + $0x750] sm:$0xff] }
  0x70   :  { %613 = vmatpush.msra.mxu0 %v309_v43  ;;  %653 = vmatpush.msra.mxu2 %v437_v52  ;;  %v278_v38 = vld [vmem:[#allocation8 + $0x1b0] sm:$0xff] }
  0x71   :  { %633 = vmatpush.msra.mxu1 %v373_v44  ;;  %594 = vmatpush.msra.mxu3 %v241_v53  ;;  %v342_v39 = vld [vmem:[#allocation8 + $0x3b0] sm:$0xff] }
  0x72   :  { %614 = vmatpush.msra.mxu0 %v305_v45  ;;  %654 = vmatpush.msra.mxu2 %v433_v56  ;;  %v394_v40 = vld [vmem:[#allocation8 + $0x550] sm:$0xff] }
  0x73   :  { %634 = vmatpush.msra.mxu1 %v369_v46  ;;  %595 = vmatpush.msra.mxu3 %v237_v57  ;;  %v454_v41 = vld [vmem:[#allocation8 + $0x730] sm:$0xff] }
  0x74   :  { %615 = vmatpush.msra.mxu0 %v301_v47  ;;  %655 = vmatpush.msra.mxu2 %v429_v60  ;;  %v274_v42 = vld [vmem:[#allocation8 + $0x190] sm:$0xff] }
  0x75   :  { %635 = vmatpush.msra.mxu1 %v365_v48  ;;  %596 = vmatpush.msra.mxu3 %v233_v61  ;;  %v338_v43 = vld [vmem:[#allocation8 + $0x390] sm:$0xff] }
  0x76   :  { %616 = vmatpush.msra.mxu0 %v297_v50  ;;  %656 = vmatpush.msra.mxu2 %v425_v62  ;;  %v390_v44 = vld [vmem:[#allocation8 + $0x530] sm:$0xff] }
  0x77   :  { %636 = vmatpush.msra.mxu1 %v361_v51  ;;  %597 = vmatpush.msra.mxu3 %v229_v63  ;;  %v450_v45 = vld [vmem:[#allocation8 + $0x710] sm:$0xff] }
  0x78   :  { %617 = vmatpush.msra.mxu0 %v293_v54  ;;  %657 = vmatpush.msra.mxu2 %v421_v0  ;;  %v270_v46 = vld [vmem:[#allocation8 + $0x170] sm:$0xff] }
  0x79   :  { %637 = vmatpush.msra.mxu1 %v357_v55  ;;  %598 = vmatpush.msra.mxu3 %v225_v1  ;;  %v334_v47 = vld [vmem:[#allocation8 + $0x370] sm:$0xff] }
  0x7a   :  { %618 = vmatpush.msra.mxu0 %v289_v58  ;;  %658 = vmatpush.msra.mxu2 %v417_v2  ;;  %v386_v48 = vld [vmem:[#allocation8 + $0x510] sm:$0xff] }
  0x7b   :  { %638 = vmatpush.msra.mxu1 %v353_v59  ;;  %v446_v49 = vld [vmem:[#allocation8 + $0x6f0] sm:$0xff] }
  0x7c   :  { %v266_v50 = vld [vmem:[#allocation8 + $0x150] sm:$0xff] }
  0x7d   :  { %v330_v51 = vld [vmem:[#allocation8 + $0x350] sm:$0xff] }
  0x7e   :  { %v382_v52 = vld [vmem:[#allocation8 + $0x4f0] sm:$0xff] }
  0x7f   :  { %v442_v53 = vld [vmem:[#allocation8 + $0x6d0] sm:$0xff] }
  0x80   :  { %v262_v54 = vld [vmem:[#allocation8 + $0x130] sm:$0xff] }
  0x81   :  { %v326_v55 = vld [vmem:[#allocation8 + $0x330] sm:$0xff] }
  0x82   :  { %v378_v56 = vld [vmem:[#allocation8 + $0x4d0] sm:$0xff] }
  0x83   :  { %v438_v57 = vld [vmem:[#allocation8 + $0x6b0] sm:$0xff] }
  0x84   :  { %v258_v58 = vld [vmem:[#allocation8 + $0x110] sm:$0xff] }
  0x85   :  { %v322_v59 = vld [vmem:[#allocation8 + $0x310] sm:$0xff] }
  0x86   :  { %v374_v60 = vld [vmem:[#allocation8 + $0x4b0] sm:$0xff] }
  0x87   :  { %v434_v61 = vld [vmem:[#allocation8 + $0x690] sm:$0xff] }
  0x88   :  { %v254_v62 = vld [vmem:[#allocation8 + $0xf0] sm:$0xff] }
  0x89   :  { %v318_v63 = vld [vmem:[#allocation8 + $0x2f0] sm:$0xff] }
  0x8a   :  { %v370_v0 = vld [vmem:[#allocation8 + $0x490] sm:$0xff] }
  0x8b   :  { %v430_v1 = vld [vmem:[#allocation8 + $0x670] sm:$0xff] }
  0x8c   :  { %v250_v2 = vld [vmem:[#allocation8 + $0xd0] sm:$0xff] }
  0x9c   :  { %v149_v6 = vpop.f32.mrf.mxu0  ;;  %v169_v7 = vpop.f32.mrf.mxu1 }
  0x9d   :  { %v150_v8 = vadd.f32 %v149_v6, %v120_v4  ;;  %v170_v9 = vadd.f32 %v169_v7, %v121_v5  ;;  %v366_v4 = vld [vmem:[#allocation8 + $0x470] sm:$0xff] }
  0x9e   :  { %v426_v5 = vld [vmem:[#allocation8 + $0x650] sm:$0xff] }
  0x9f   :  { %vm212_vm2 = vcmp.gt.f32.partialorder %v150_v8, 0.0  ;;  %v216_v10 = vmul.f32 0.2, %v150_v8  ;;  %vm213_vm3 = vcmp.gt.f32.partialorder %v170_v9, 0.0  ;;  %v217_v11 = vmul.f32 0.2, %v170_v9 }
  0xa0   :  { %v246_v6 = vld [vmem:[#allocation8 + $0xb0] sm:$0xff] }
  0xa1   :  { %v1284_v16 = vsel %vm212_vm2, %v150_v8, %v216_v10  ;;  %v1286_v17 = vsel %vm213_vm3, %v170_v9, %v217_v11  ;;  %v310_v7 = vld [vmem:[#allocation8 + $0x2b0] sm:$0xff] }
  0xa2   :  { %519 = vmatmul.f32.vlgmr.msrb.gmra.mxu0 %v1284_v16  ;;  %539 = vmatmul.f32.vlgmr.msrb.gmra.mxu1 %v1286_v17  ;;  %v362_v8 = vld [vmem:[#allocation8 + $0x450] sm:$0xff] }
  0xa3   :  { %v189_v20 = vpop.f32.mrf.mxu2  ;;  %v209_v21 = vpop.f32.mrf.mxu3  ;;  %703 = vmatpush.msrb.mxu0 %v414_v14  ;;  %1017 = vmatpush.msk.msrb.mxu1 %vm490_vm1, %v474_v15  ;;  %v422_v9 = vld [vmem:[#allocation8 + $0x630] sm:$0xff]  ;;  %v287_v15 = vld [vmem:[#allocation8 + $0x1f8] sm:$0xff] }
  0xa4   :  { %v190_v22 = vadd.f32 %v189_v20, %v122_v12  ;;  %v210_v23 = vadd.f32 %v209_v21, %v123_v13  ;;  %v242_v10 = vld [vmem:[#allocation8 + $0x90] sm:$0xff]  ;;  %v283_v21 = vld [vmem:[#allocation8 + $0x1d8] sm:$0xff] }
  0xa5   :  { %704 = vmatpush.msrb.mxu0 %v410_v18  ;;  %725 = vmatpush.msrb.mxu1 %v470_v19  ;;  %v306_v11 = vld [vmem:[#allocation8 + $0x290] sm:$0xff] }
  0xa6   :  { %vm214_vm5 = vcmp.gt.f32.partialorder %v190_v22, 0.0  ;;  %v218_v26 = vmul.f32 0.2, %v190_v22  ;;  %vm215_vm6 = vcmp.gt.f32.partialorder %v210_v23, 0.0  ;;  %v219_v27 = vmul.f32 0.2, %v210_v23 }
  0xa7   :  { %705 = vmatpush.msrb.mxu0 %v406_v24  ;;  %726 = vmatpush.msrb.mxu1 %v466_v25  ;;  %v358_v12 = vld [vmem:[#allocation8 + $0x430] sm:$0xff]  ;;  %v279_v24 = vld [vmem:[#allocation8 + $0x1b8] sm:$0xff] }
  0xa8   :  { %v1291_v30 = vsel %vm214_vm5, %v190_v22, %v218_v26  ;;  %v1293_v31 = vsel %vm215_vm6, %v210_v23, %v219_v27  ;;  %v418_v13 = vld [vmem:[#allocation8 + $0x610] sm:$0xff]  ;;  %v475_v22 = vld [vmem:[#allocation8 + $0x7d8] sm:$0xf] }
  0xa9   :  { %559 = vmatmul.f32.vlgmr.msrb.gmra.mxu2 %v1291_v30  ;;  %1014 = vmatmul.msk.f32.vlgmr.msrb.gmra.mxu3 %vm486_vm4, %v1293_v31  ;;  %v238_v14 = vld [vmem:[#allocation8 + $0x70] sm:$0xff]  ;;  %v471_v26 = vld [vmem:[#allocation8 + $0x7b8] sm:$0xff] }
  0xaa   :  { %663 = vmatpush.msrb.mxu2 %v286_v28  ;;  %683 = vmatpush.msrb.mxu3 %v350_v29  ;;  %v302_v18 = vld [vmem:[#allocation8 + $0x270] sm:$0xff]  ;;  %v275_v28 = vld [vmem:[#allocation8 + $0x198] sm:$0xff] }
  0xab   :  { %706 = vmatpush.msrb.mxu0 %v402_v32  ;;  %727 = vmatpush.msrb.mxu1 %v462_v33  ;;  %v354_v19 = vld [vmem:[#allocation8 + $0x410] sm:$0xff]  ;;  %v467_v32 = vld [vmem:[#allocation8 + $0x798] sm:$0xff] }
  0xac   :  { %639 = vmatmul.f32.vlgmr.msra.gmra.mxu1 %v1291_v30  ;;  %664 = vmatpush.msrb.mxu2 %v282_v34  ;;  %v234_v20 = vld [vmem:[#allocation8 + $0x50] sm:$0xff]  ;;  %v271_v34 = vld [vmem:[#allocation8 + $0x178] sm:$0xff] }
  0xad   :  { %684 = vmatpush.msrb.mxu3 %v346_v35  ;;  %707 = vmatpush.msrb.mxu0 %v398_v36  ;;  %v298_v23 = vld [vmem:[#allocation8 + $0x250] sm:$0xff]  ;;  %v351_v35 = vld [vmem:[#allocation8 + $0x3f8] sm:$0xff] }
  0xae   :  { %728 = vmatpush.msrb.mxu1 %v458_v37  ;;  %619 = vmatmul.f32.vlgmr.msra.gmra.mxu0 %v1286_v17  ;;  %v230_v25 = vld [vmem:[#allocation8 + $0x30] sm:$0xff]  ;;  %v415_v36 = vld [vmem:[#allocation8 + $0x5f8] sm:$0xff] }
  0xaf   :  { %665 = vmatpush.msrb.mxu2 %v278_v38  ;;  %685 = vmatpush.msrb.mxu3 %v342_v39  ;;  %v294_v27 = vld [vmem:[#allocation8 + $0x230] sm:$0xff]  ;;  %v463_v37 = vld [vmem:[#allocation8 + $0x778] sm:$0xff] }
  0xb0   :  { %708 = vmatpush.msrb.mxu0 %v394_v40  ;;  %729 = vmatpush.msrb.mxu1 %v454_v41  ;;  %v226_v29 = vld [vmem:[#allocation8 + $0x10] sm:$0xff]  ;;  %v267_v38 = vld [vmem:[#allocation8 + $0x158] sm:$0xff] }
  0xb1   :  { %666 = vmatpush.msrb.mxu2 %v274_v42  ;;  %686 = vmatpush.msrb.mxu3 %v338_v43  ;;  %v290_v33 = vld [vmem:[#allocation8 + $0x210] sm:$0xff]  ;;  %v347_v39 = vld [vmem:[#allocation8 + $0x3d8] sm:$0xff] }
  0xb2   :  { %709 = vmatpush.msrb.mxu0 %v390_v44  ;;  %730 = vmatpush.msrb.mxu1 %v450_v45  ;;  %v411_v40 = vld [vmem:[#allocation8 + $0x5d8] sm:$0xff] }
  0xb3   :  { %599 = vmatmul.f32.vlgmr.msra.gmra.mxu3 %v1284_v16  ;;  %1016 = vmatmul.msk.f32.vlgmr.msra.gmra.mxu2 %vm486_vm4, %v1293_v31  ;;  %v459_v41 = vld [vmem:[#allocation8 + $0x758] sm:$0xff] }
  0xb4   :  { %667 = vmatpush.msrb.mxu2 %v270_v46  ;;  %687 = vmatpush.msrb.mxu3 %v334_v47  ;;  %v263_v42 = vld [vmem:[#allocation8 + $0x138] sm:$0xff] }
  0xb5   :  { %710 = vmatpush.msrb.mxu0 %v386_v48  ;;  %731 = vmatpush.msrb.mxu1 %v446_v49  ;;  %v343_v43 = vld [vmem:[#allocation8 + $0x3b8] sm:$0xff] }
  0xb6   :  { %668 = vmatpush.msrb.mxu2 %v266_v50  ;;  %688 = vmatpush.msrb.mxu3 %v330_v51  ;;  %v407_v44 = vld [vmem:[#allocation8 + $0x5b8] sm:$0xff] }
  0xb7   :  { %711 = vmatpush.msrb.mxu0 %v382_v52  ;;  %732 = vmatpush.msrb.mxu1 %v442_v53  ;;  %v455_v45 = vld [vmem:[#allocation8 + $0x738] sm:$0xff] }
  0xb8   :  { %669 = vmatpush.msrb.mxu2 %v262_v54  ;;  %689 = vmatpush.msrb.mxu3 %v326_v55  ;;  %v259_v46 = vld [vmem:[#allocation8 + $0x118] sm:$0xff] }
  0xb9   :  { %712 = vmatpush.msrb.mxu0 %v378_v56  ;;  %733 = vmatpush.msrb.mxu1 %v438_v57  ;;  %v339_v47 = vld [vmem:[#allocation8 + $0x398] sm:$0xff] }
  0xba   :  { %670 = vmatpush.msrb.mxu2 %v258_v58  ;;  %690 = vmatpush.msrb.mxu3 %v322_v59  ;;  %v403_v48 = vld [vmem:[#allocation8 + $0x598] sm:$0xff] }
  0xbb   :  { %713 = vmatpush.msrb.mxu0 %v374_v60  ;;  %734 = vmatpush.msrb.mxu1 %v434_v61  ;;  %v451_v49 = vld [vmem:[#allocation8 + $0x718] sm:$0xff] }
  0xbc   :  { %671 = vmatpush.msrb.mxu2 %v254_v62  ;;  %691 = vmatpush.msrb.mxu3 %v318_v63  ;;  %v255_v50 = vld [vmem:[#allocation8 + $0xf8] sm:$0xff] }
  0xbd   :  { %714 = vmatpush.msrb.mxu0 %v370_v0  ;;  %735 = vmatpush.msrb.mxu1 %v430_v1  ;;  %v335_v51 = vld [vmem:[#allocation8 + $0x378] sm:$0xff] }
  0xbe   :  { %672 = vmatpush.msrb.mxu2 %v250_v2  ;;  %692 = vmatpush.msrb.mxu3 %v314_v3  ;;  %v399_v52 = vld [vmem:[#allocation8 + $0x578] sm:$0xff] }
  0xbf   :  { %715 = vmatpush.msrb.mxu0 %v366_v4  ;;  %736 = vmatpush.msrb.mxu1 %v426_v5  ;;  %v447_v53 = vld [vmem:[#allocation8 + $0x6f8] sm:$0xff] }
  0xc0   :  { %673 = vmatpush.msrb.mxu2 %v246_v6  ;;  %693 = vmatpush.msrb.mxu3 %v310_v7  ;;  %v251_v54 = vld [vmem:[#allocation8 + $0xd8] sm:$0xff] }
  0xc1   :  { %716 = vmatpush.msrb.mxu0 %v362_v8  ;;  %737 = vmatpush.msrb.mxu1 %v422_v9  ;;  %v331_v55 = vld [vmem:[#allocation8 + $0x358] sm:$0xff] }
  0xc2   :  { %674 = vmatpush.msrb.mxu2 %v242_v10  ;;  %694 = vmatpush.msrb.mxu3 %v306_v11  ;;  %v395_v56 = vld [vmem:[#allocation8 + $0x558] sm:$0xff] }
  0xc3   :  { %717 = vmatpush.msrb.mxu0 %v358_v12  ;;  %738 = vmatpush.msrb.mxu1 %v418_v13  ;;  %v443_v57 = vld [vmem:[#allocation8 + $0x6d8] sm:$0xff] }
  0xc4   :  { %1018 = vmatmul.msk.f32.vlgmr.msrb.gmra.mxu1 %vm486_vm4, %v1293_v31  ;;  %675 = vmatpush.msrb.mxu2 %v238_v14  ;;  %v247_v58 = vld [vmem:[#allocation8 + $0xb8] sm:$0xff] }
  0xc5   :  { %743 = vmatpush.msra.mxu1 %v287_v15  ;;  %695 = vmatpush.msrb.mxu3 %v302_v18  ;;  %v327_v59 = vld [vmem:[#allocation8 + $0x338] sm:$0xff] }
  0xc6   :  { %718 = vmatpush.msrb.mxu0 %v354_v19  ;;  %676 = vmatpush.msrb.mxu2 %v234_v20  ;;  %v391_v60 = vld [vmem:[#allocation8 + $0x538] sm:$0xff] }
  0xc7   :  { %719 = vmatmul.f32.vlgmr.msrb.gmra.mxu0 %v1291_v30  ;;  %744 = vmatpush.msra.mxu1 %v283_v21  ;;  %v439_v61 = vld [vmem:[#allocation8 + $0x6b8] sm:$0xff] }
  0xc8   :  { %1019 = vmatpush.msk.msra.mxu0 %vm490_vm1, %v475_v22  ;;  %696 = vmatpush.msrb.mxu3 %v298_v23  ;;  %v243_v62 = vld [vmem:[#allocation8 + $0x98] sm:$0xff] }
  0xc9   :  { %745 = vmatpush.msra.mxu1 %v279_v24  ;;  %677 = vmatpush.msrb.mxu2 %v230_v25  ;;  %v323_v63 = vld [vmem:[#allocation8 + $0x318] sm:$0xff] }
  0xca   :  { %805 = vmatpush.msra.mxu0 %v471_v26  ;;  %697 = vmatpush.msrb.mxu3 %v294_v27  ;;  %v387_v0 = vld [vmem:[#allocation8 + $0x518] sm:$0xff] }
  0xcb   :  { %746 = vmatpush.msra.mxu1 %v275_v28  ;;  %678 = vmatpush.msrb.mxu2 %v226_v29  ;;  %v435_v1 = vld [vmem:[#allocation8 + $0x698] sm:$0xff]  ;;  %v848_v28 = vld [vmem:[#allocation11 + $0x68] sm:$0xff] }
  0xcc   :  { %806 = vmatpush.msra.mxu0 %v467_v32  ;;  %698 = vmatpush.msrb.mxu3 %v290_v33  ;;  %v239_v2 = vld [vmem:[#allocation8 + $0x78] sm:$0xff] }
  0xcd   :  { %679 = vmatmul.f32.vlgmr.msrb.gmra.mxu2 %v1284_v16  ;;  %699 = vmatmul.f32.vlgmr.msrb.gmra.mxu3 %v1286_v17  ;;  %v319_v3 = vld [vmem:[#allocation8 + $0x2f8] sm:$0xff] }
  0xce   :  { %747 = vmatpush.msra.mxu1 %v271_v34  ;;  %763 = vmatpush.msra.mxu2 %v351_v35  ;;  %v383_v4 = vld [vmem:[#allocation8 + $0x4f8] sm:$0xff]  ;;  %v844_v34 = vld [vmem:[#allocation11 + $0x48] sm:$0xff] }
  0xcf   :  { %783 = vmatpush.msra.mxu3 %v415_v36  ;;  %807 = vmatpush.msra.mxu0 %v463_v37  ;;  %v431_v5 = vld [vmem:[#allocation8 + $0x678] sm:$0xff]  ;;  %v843_v36 = vld [vmem:[#allocation11 + $0x40] sm:$0xff] }
  0xd0   :  { %748 = vmatpush.msra.mxu1 %v267_v38  ;;  %764 = vmatpush.msra.mxu2 %v347_v39  ;;  %v235_v6 = vld [vmem:[#allocation8 + $0x58] sm:$0xff]  ;;  %v864_v39 = vld [vmem:[#allocation11 + $0xe8] sm:$0xff] }
  0xd1   :  { %784 = vmatpush.msra.mxu3 %v411_v40  ;;  %808 = vmatpush.msra.mxu0 %v459_v41  ;;  %v315_v7 = vld [vmem:[#allocation8 + $0x2d8] sm:$0xff]  ;;  %v863_v41 = vld [vmem:[#allocation11 + $0xe0] sm:$0xff] }
  0xd2   :  { %749 = vmatpush.msra.mxu1 %v263_v42  ;;  %765 = vmatpush.msra.mxu2 %v343_v43  ;;  %v379_v8 = vld [vmem:[#allocation8 + $0x4d8] sm:$0xff]  ;;  %v839_v42 = vld [vmem:[#allocation11 + $0x20] sm:$0xff] }
  0xd3   :  { %785 = vmatpush.msra.mxu3 %v407_v44  ;;  %809 = vmatpush.msra.mxu0 %v455_v45  ;;  %v427_v9 = vld [vmem:[#allocation8 + $0x658] sm:$0xff]  ;;  %v860_v45 = vld [vmem:[#allocation11 + $0xc8] sm:$0xff] }
  0xd4   :  { %750 = vmatpush.msra.mxu1 %v259_v46  ;;  %766 = vmatpush.msra.mxu2 %v339_v47  ;;  %v231_v10 = vld [vmem:[#allocation8 + $0x38] sm:$0xff]  ;;  %v859_v47 = vld [vmem:[#allocation11 + $0xc0] sm:$0xff] }
  0xd5   :  { %786 = vmatpush.msra.mxu3 %v403_v48  ;;  %810 = vmatpush.msra.mxu0 %v451_v49  ;;  %v311_v11 = vld [vmem:[#allocation8 + $0x2b8] sm:$0xff]  ;;  %v836_v48 = vld [vmem:[#allocation11 + $0x8] sm:$0xff] }
  0xd6   :  { %751 = vmatpush.msra.mxu1 %v255_v50  ;;  %767 = vmatpush.msra.mxu2 %v335_v51  ;;  %v375_v12 = vld [vmem:[#allocation8 + $0x4b8] sm:$0xff]  ;;  %v835_v50 = vld [vmem:[#allocation11] sm:$0xff] }
  0xd7   :  { %787 = vmatpush.msra.mxu3 %v399_v52  ;;  %811 = vmatpush.msra.mxu0 %v447_v53  ;;  %v423_v13 = vld [vmem:[#allocation8 + $0x638] sm:$0xff]  ;;  %v856_v52 = vld [vmem:[#allocation11 + $0xa8] sm:$0xff]  ;;  %v855_v53 = vld [vmem:[#allocation11 + $0xa0] sm:$0xff] }
  0xd8   :  { %752 = vmatpush.msra.mxu1 %v251_v54  ;;  %768 = vmatpush.msra.mxu2 %v331_v55  ;;  %v227_v14 = vld [vmem:[#allocation8 + $0x18] sm:$0xff]  ;;  %v1314_v54 = vld [vmem:[#allocation10] sm:$0xf] }
  0xd9   :  { %788 = vmatpush.msra.mxu3 %v395_v56  ;;  %812 = vmatpush.msra.mxu0 %v443_v57  ;;  %v307_v15 = vld [vmem:[#allocation8 + $0x298] sm:$0xff] }
  0xda   :  { %753 = vmatpush.msra.mxu1 %v247_v58  ;;  %769 = vmatpush.msra.mxu2 %v327_v59  ;;  %v371_v18 = vld [vmem:[#allocation8 + $0x498] sm:$0xff]  ;;  %v880_v59 = vld [vmem:[#allocation11 + $0x168] sm:$0xff] }
  0xdb   :  { %789 = vmatpush.msra.mxu3 %v391_v60  ;;  %813 = vmatpush.msra.mxu0 %v439_v61  ;;  %v419_v19 = vld [vmem:[#allocation8 + $0x618] sm:$0xff]  ;;  %v478_v60 = vperm.slane %v1314_v54, 0  ;;  %v852_v61 = vld [vmem:[#allocation11 + $0x88] sm:$0xff] }
  0xdc   :  { %754 = vmatpush.msra.mxu1 %v243_v62  ;;  %770 = vmatpush.msra.mxu2 %v323_v63  ;;  %v303_v20 = vld [vmem:[#allocation8 + $0x278] sm:$0xff]  ;;  %v879_v62 = vld [vmem:[#allocation11 + $0x160] sm:$0xff] }
  0xdd   :  { %790 = vmatpush.msra.mxu3 %v387_v0  ;;  %814 = vmatpush.msra.mxu0 %v435_v1  ;;  %v367_v21 = vld [vmem:[#allocation8 + $0x478] sm:$0xff]  ;;  %v851_v0 = vld [vmem:[#allocation11 + $0x80] sm:$0xff] }
  0xde   :  { %755 = vmatpush.msra.mxu1 %v239_v2  ;;  %771 = vmatpush.msra.mxu2 %v319_v3  ;;  %v850_v22 = vld [vmem:[#allocation11 + $0x78] sm:$0xff]  ;;  %v849_v25 = vld [vmem:[#allocation11 + $0x70] sm:$0xff] }
  0xdf   :  { %791 = vmatpush.msra.mxu3 %v383_v4  ;;  %815 = vmatpush.msra.mxu0 %v431_v5  ;;  %v299_v23 = vld [vmem:[#allocation8 + $0x258] sm:$0xff]  ;;  %v876_v5 = vld [vmem:[#allocation11 + $0x148] sm:$0xff] }
  0xe0   :  { %756 = vmatpush.msra.mxu1 %v235_v6  ;;  %772 = vmatpush.msra.mxu2 %v315_v7  ;;  %v363_v24 = vld [vmem:[#allocation8 + $0x458] sm:$0xff]  ;;  %v875_v7 = vld [vmem:[#allocation11 + $0x140] sm:$0xff] }
  0xe1   :  { %792 = vmatpush.msra.mxu3 %v379_v8  ;;  %816 = vmatpush.msra.mxu0 %v427_v9  ;;  %v295_v26 = vld [vmem:[#allocation8 + $0x238] sm:$0xff] }
  0xe2   :  { %757 = vmatpush.msra.mxu1 %v231_v10  ;;  %773 = vmatpush.msra.mxu2 %v311_v11  ;;  %v359_v27 = vld [vmem:[#allocation8 + $0x438] sm:$0xff] }
  0xe3   :  { %793 = vmatpush.msra.mxu3 %v375_v12  ;;  %817 = vmatpush.msra.mxu0 %v423_v13  ;;  %v291_v29 = vld [vmem:[#allocation8 + $0x218] sm:$0xff] }
  0xe4   :  { %758 = vmatpush.msra.mxu1 %v227_v14  ;;  %774 = vmatpush.msra.mxu2 %v307_v15  ;;  %v355_v32 = vld [vmem:[#allocation8 + $0x418] sm:$0xff]  ;;  %v872_v15 = vld [vmem:[#allocation11 + $0x128] sm:$0xff] }
  0xe5   :  { %794 = vmatpush.msra.mxu3 %v371_v18  ;;  %818 = vmatpush.msra.mxu0 %v419_v19  ;;  %v845_v33 = vld [vmem:[#allocation11 + $0x50] sm:$0xff]  ;;  %v866_v35 = vld [vmem:[#allocation11 + $0xf8] sm:$0xff]  ;;  %v479_v18 = vperm.slane %v1314_v54, 1 }
  0xe6   :  { %759 = vmatmul.f32.vlgmr.msra.gmra.mxu1 %v1284_v16  ;;  %1020 = vmatmul.msk.f32.vlgmr.msra.gmra.mxu0 %vm486_vm4, %v1293_v31  ;;  %v847_v16 = vld [vmem:[#allocation11 + $0x60] sm:$0xff]  ;;  %v846_v31 = vld [vmem:[#allocation11 + $0x58] sm:$0xff]  ;;  %v865_v37 = vld [vmem:[#allocation11 + $0xf0] sm:$0xff] }
  0xe7   :  { %775 = vmatpush.msra.mxu2 %v303_v20  ;;  %795 = vmatpush.msra.mxu3 %v367_v21  ;;  %v842_v38 = vld [vmem:[#allocation11 + $0x38] sm:$0xff]  ;;  %v841_v40 = vld [vmem:[#allocation11 + $0x30] sm:$0xff]  ;;  %v871_v20 = vld [vmem:[#allocation11 + $0x120] sm:$0xff] }
  0xe8   :  { %908 = vmatpush.msrb.mxu0 %v850_v22  ;;  %928 = vmatpush.msrb.mxu1 %v866_v35  ;;  %v861_v43 = vld [vmem:[#allocation11 + $0xd0] sm:$0xff]  ;;  %v838_v44 = vld [vmem:[#allocation11 + $0x18] sm:$0xff]  ;;  %v895_v35 = vld [vmem:[#allocation11 + $0x1e0] sm:$0xff] }
  0xe9   :  { %776 = vmatpush.msra.mxu2 %v299_v23  ;;  %796 = vmatpush.msra.mxu3 %v363_v24  ;;  %v837_v46 = vld [vmem:[#allocation11 + $0x10] sm:$0xff]  ;;  %v858_v49 = vld [vmem:[#allocation11 + $0xb8] sm:$0xff] }
  0xea   :  { %909 = vmatpush.msrb.mxu0 %v849_v25  ;;  %929 = vmatpush.msrb.mxu1 %v865_v37  ;;  %v857_v51 = vld [vmem:[#allocation11 + $0xb0] sm:$0xff]  ;;  %v882_v55 = vld [vmem:[#allocation11 + $0x178] sm:$0xff] }
  0xeb   :  { %777 = vmatpush.msra.mxu2 %v295_v26  ;;  %797 = vmatpush.msra.mxu3 %v359_v27  ;;  %v854_v56 = vld [vmem:[#allocation11 + $0x98] sm:$0xff]  ;;  %v881_v57 = vld [vmem:[#allocation11 + $0x170] sm:$0xff]  ;;  %v868_v26 = vld [vmem:[#allocation11 + $0x108] sm:$0xff] }
  0xec   :  { %910 = vmatpush.msrb.mxu0 %v848_v28  ;;  %930 = vmatpush.msrb.mxu1 %v864_v39  ;;  %v853_v58 = vld [vmem:[#allocation11 + $0x90] sm:$0xff]  ;;  %v878_v1 = vld [vmem:[#allocation11 + $0x158] sm:$0xff] }
  0xed   :  { %778 = vmatpush.msra.mxu2 %v291_v29  ;;  %798 = vmatpush.msra.mxu3 %v355_v32  ;;  %v877_v3 = vld [vmem:[#allocation11 + $0x150] sm:$0xff]  ;;  %v874_v10 = vld [vmem:[#allocation11 + $0x138] sm:$0xff]  ;;  %v867_v29 = vld [vmem:[#allocation11 + $0x100] sm:$0xff] }
  0xee   :  { %779 = vmatmul.f32.vlgmr.msra.gmra.mxu2 %v1286_v17  ;;  %799 = vmatmul.f32.vlgmr.msra.gmra.mxu3 %v1291_v30  ;;  %v840_v17 = vld [vmem:[#allocation11 + $0x28] sm:$0xff]  ;;  %v862_v30 = vld [vmem:[#allocation11 + $0xd8] sm:$0xff]  ;;  %v873_v12 = vld [vmem:[#allocation11 + $0x130] sm:$0xff] }
  0xef   :  { %911 = vmatpush.msrb.mxu0 %v847_v16  ;;  %931 = vmatpush.msrb.mxu1 %v863_v41  ;;  %v870_v22 = vld [vmem:[#allocation11 + $0x118] sm:$0xff]  ;;  %v869_v24 = vld [vmem:[#allocation11 + $0x110] sm:$0xff]  ;;  %v891_v41 = vld [vmem:[#allocation11 + $0x1c0] sm:$0xff] }
  0xf0   :  { %948 = vmatpush.msrb.mxu2 %v882_v55  ;;  %v893_v39 = vld [vmem:[#allocation11 + $0x1d0] sm:$0xff] }
  0xf1   :  { %912 = vmatpush.msrb.mxu0 %v846_v31  ;;  %932 = vmatpush.msrb.mxu1 %v862_v30  ;;  %v897_v31 = vld [vmem:[#allocation11 + $0x1f0] sm:$0xf] }
  0xf2   :  { %949 = vmatpush.msrb.mxu2 %v881_v57  ;;  %1021 = vmatpush.msk.msrb.mxu3 %vm490_vm1, %v897_v31  ;;  %v889_v30 = vld [vmem:[#allocation11 + $0x1b0] sm:$0xff]  ;;  %v883_v57 = vld [vmem:[#allocation11 + $0x180] sm:$0xff] }
  0xf3   :  { %913 = vmatpush.msrb.mxu0 %v845_v33  ;;  %933 = vmatpush.msrb.mxu1 %v861_v43  ;;  %v896_v33 = vld [vmem:[#allocation11 + $0x1e8] sm:$0xff] }
  0xf4   :  { %950 = vmatpush.msrb.mxu2 %v880_v59  ;;  %970 = vmatpush.msrb.mxu3 %v896_v33  ;;  %v888_v43 = vld [vmem:[#allocation11 + $0x1a8] sm:$0xff] }
  0xf5   :  { %914 = vmatpush.msrb.mxu0 %v844_v34  ;;  %934 = vmatpush.msrb.mxu1 %v860_v45 }
  0xf6   :  { %951 = vmatpush.msrb.mxu2 %v879_v62  ;;  %971 = vmatpush.msrb.mxu3 %v895_v35 }
  0xf7   :  { %915 = vmatpush.msrb.mxu0 %v843_v36  ;;  %935 = vmatpush.msrb.mxu1 %v859_v47 }
  0xf8   :  { %952 = vmatpush.msrb.mxu2 %v878_v1 }
  0xf9   :  { %916 = vmatpush.msrb.mxu0 %v842_v38  ;;  %936 = vmatpush.msrb.mxu1 %v858_v49  ;;  %v894_v38 = vld [vmem:[#allocation11 + $0x1d8] sm:$0xff] }
  0xfa   :  { %953 = vmatpush.msrb.mxu2 %v877_v3  ;;  %972 = vmatpush.msrb.mxu3 %v894_v38  ;;  %v886_v49 = vld [vmem:[#allocation11 + $0x198] sm:$0xff] }
  0xfb   :  { %917 = vmatpush.msrb.mxu0 %v841_v40  ;;  %937 = vmatpush.msrb.mxu1 %v857_v51  ;;  %v892_v40 = vld [vmem:[#allocation11 + $0x1c8] sm:$0xff] }
  0xfc   :  { %954 = vmatpush.msrb.mxu2 %v876_v5  ;;  %973 = vmatpush.msrb.mxu3 %v893_v39 }
  0xfd   :  { %918 = vmatpush.msrb.mxu0 %v840_v17  ;;  %938 = vmatpush.msrb.mxu1 %v856_v52  ;;  %v890_v17 = vld [vmem:[#allocation11 + $0x1b8] sm:$0xff]  ;;  %v885_v52 = vld [vmem:[#allocation11 + $0x190] sm:$0xff] }
  0xfe   :  { %955 = vmatpush.msrb.mxu2 %v875_v7  ;;  %974 = vmatpush.msrb.mxu3 %v892_v40  ;;  %v1034_v7 = vld [vmem:[%s1334_s6] ss:$0 sm:$0xff] }
  0xff   :  { %919 = vmatpush.msrb.mxu0 %v839_v42  ;;  %939 = vmatpush.msrb.mxu1 %v855_v53  ;;  %v480_v42 = vperm.slane %v1314_v54, 2 }
 0x100   :  { %956 = vmatpush.msrb.mxu2 %v874_v10  ;;  %975 = vmatpush.msrb.mxu3 %v891_v41 }
 0x101   :  { %920 = vmatpush.msrb.mxu0 %v838_v44  ;;  %940 = vmatpush.msrb.mxu1 %v854_v56  ;;  %v884_v56 = vld [vmem:[#allocation11 + $0x188] sm:$0xff] }
 0x102   :  { %957 = vmatpush.msrb.mxu2 %v873_v12  ;;  %976 = vmatpush.msrb.mxu3 %v890_v17 }
 0x103   :  { %921 = vmatpush.msrb.mxu0 %v837_v46  ;;  %941 = vmatpush.msrb.mxu1 %v853_v58  ;;  %v887_v46 = vld [vmem:[#allocation11 + $0x1a0] sm:$0xff] }
 0x104   :  { %958 = vmatpush.msrb.mxu2 %v872_v15  ;;  %977 = vmatpush.msrb.mxu3 %v889_v30 }
 0x105   :  { %922 = vmatpush.msrb.mxu0 %v836_v48  ;;  %942 = vmatpush.msrb.mxu1 %v852_v61 }
 0x106   :  { %959 = vmatpush.msrb.mxu2 %v871_v20  ;;  %978 = vmatpush.msrb.mxu3 %v888_v43 }
 0x107   :  { %923 = vmatpush.msrb.mxu0 %v835_v50  ;;  %943 = vmatpush.msrb.mxu1 %v851_v0 }
 0x108   :  { %960 = vmatpush.msrb.mxu2 %v870_v22  ;;  %979 = vmatpush.msrb.mxu3 %v887_v46 }
 0x10a   :  { %961 = vmatpush.msrb.mxu2 %v869_v24  ;;  %980 = vmatpush.msrb.mxu3 %v886_v49 }
 0x10c   :  { %962 = vmatpush.msrb.mxu2 %v868_v26  ;;  %981 = vmatpush.msrb.mxu3 %v885_v52 }
 0x10e   :  { %963 = vmatpush.msrb.mxu2 %v867_v29  ;;  %982 = vmatpush.msrb.mxu3 %v884_v56 }
 0x110   :  { %983 = vmatpush.msrb.mxu3 %v883_v57 }
 0x11f   :  { %v520_v63 = vpop.f32.mrf.mxu0  ;;  %v540_v4 = vpop.f32.mrf.mxu1 }
 0x120   :  { %v521_v2 = vadd.f32 %v520_v63, %v478_v60  ;;  %v481_v60 = vperm.slane %v1314_v54, 3 }
 0x122   :  { %v541_v6 = vadd.f32 %v540_v4, %v521_v2 }
 0x129   :  { %v640_v28 = vpop.f32.mrf.mxu1 }
 0x12b   :  { %v620_v25 = vpop.f32.mrf.mxu0 }
 0x12c   :  { %v560_v8 = vpop.f32.mrf.mxu2  ;;  %v580_v9 = vpop.f32.mrf.mxu3 }
 0x12d   :  { %v561_v11 = vadd.f32 %v560_v8, %v541_v6 }
 0x12f   :  { %v581_v13 = vadd.f32 %v580_v9, %v561_v11 }
 0x131   :  { %vm823_vm7 = vcmp.gt.f32.partialorder %v581_v13, 0.0  ;;  %v827_v14 = vmul.f32 0.2, %v581_v13 }
 0x133   :  { %v831_v19 = vsel %vm823_vm7, %v581_v13, %v827_v14 }
 0x134   :  { %924 = vmatmul.f32.vlgmr.msrb.gmra.mxu0 %v831_v19 }
 0x136   :  { %v600_v21 = vpop.f32.mrf.mxu3  ;;  %v660_v16 = vpop.f32.mrf.mxu2 }
 0x137   :  { %v601_v23 = vadd.f32 %v600_v21, %v479_v18 }
 0x139   :  { %v621_v27 = vadd.f32 %v620_v25, %v601_v23 }
 0x13b   :  { %v641_v32 = vadd.f32 %v640_v28, %v621_v27 }
 0x13d   :  { %v661_v34 = vadd.f32 %v660_v16, %v641_v32 }
 0x13f   :  { %vm824_vm8 = vcmp.gt.f32.partialorder %v661_v34, 0.0  ;;  %v828_v36 = vmul.f32 0.2, %v661_v34 }
 0x141   :  { %v832_v37 = vsel %vm824_vm8, %v661_v34, %v828_v36  ;;  %v740_v53 = vpop.f32.mrf.mxu1 }
 0x142   :  { %944 = vmatmul.f32.vlgmr.msrb.gmra.mxu1 %v832_v37 }
 0x144   :  { %v720_v50 = vpop.f32.mrf.mxu0 }
 0x150   :  { %v680_v44 = vpop.f32.mrf.mxu2  ;;  %v700_v47 = vpop.f32.mrf.mxu3 }
 0x151   :  { %v681_v45 = vadd.f32 %v680_v44, %v480_v42 }
 0x153   :  { %v701_v48 = vadd.f32 %v700_v47, %v681_v45 }
 0x155   :  { %v721_v51 = vadd.f32 %v720_v50, %v701_v48 }
 0x157   :  { %v741_v55 = vadd.f32 %v740_v53, %v721_v51 }
 0x159   :  { %vm825_vm9 = vcmp.gt.f32.partialorder %v741_v55, 0.0  ;;  %v829_v58 = vmul.f32 0.2, %v741_v55 }
 0x15b   :  { %v833_v59 = vsel %vm825_vm9, %v741_v55, %v829_v58 }
 0x15c   :  { %964 = vmatmul.f32.vlgmr.msrb.gmra.mxu2 %v833_v59 }
 0x163   :  { %v760_v61 = vpop.f32.mrf.mxu1  ;;  %v820_v3 = vpop.f32.mrf.mxu0 }
 0x164   :  { %v761_v62 = vadd.f32 %v760_v61, %v481_v60 }
 0x171   :  { %v780_v63 = vpop.f32.mrf.mxu2  ;;  %v800_v1 = vpop.f32.mrf.mxu3 }
 0x172   :  { %v781_v0 = vadd.f32 %v780_v63, %v761_v62 }
 0x174   :  { %v801_v2 = vadd.f32 %v800_v1, %v781_v0 }
 0x176   :  { %v821_v4 = vadd.f32 %v820_v3, %v801_v2 }
 0x178   :  { %vm826_vm10 = vcmp.gt.f32.partialorder %v821_v4, 0.0  ;;  %v830_v5 = vmul.f32 0.2, %v821_v4 }
 0x17a   :  { %v834_v6 = vsel %vm826_vm10, %v821_v4, %v830_v5 }
 0x17b   :  { %1022 = vmatmul.msk.f32.vlgmr.msrb.gmra.mxu3 %vm486_vm4, %v834_v6 }
 0x1b1   :  { %v925_v8 = vpop.f32.mrf.mxu0 }
 0x1b2   :  { %v926_v54 = vadd.f32 %v1034_v7, %v925_v8 }
 0x1bf   :  { %v945_v9 = vpop.f32.mrf.mxu1 }
 0x1c0   :  { %v946_v11 = vadd.f32 %v945_v9, %v926_v54 }
 0x1df   :  { %v965_v10 = vpop.f32.mrf.mxu2 }
 0x1e0   :  { %v966_v12 = vadd.f32 %v965_v10, %v946_v11 }
 0x1fe   :  { %v985_v13 = vpop.f32.mrf.mxu3 }
 0x1ff   :  { %v986_v14 = vadd.f32 %v985_v13, %v966_v12 }
 0x201   :  { %988 = vst [vmem:[#allocation13] sm:$0xff] %v986_v14 }
 0x202   :  { %999 = dma.vmem_to_hbm [thread:$0]  %s995_s9, 128, %s997_s12, [#allocation4]  }
 0x203   :  { %1211 = dma.done.wait [#allocation4], 128  }
 0x204   :  { %1212 = vsyncadd [#allocation4], 4294967168 }
 0x205   :  { %1004 = vsyncpa [#allocation3], 1 }
 0x206   :  { %1005 = vsyncpa [#allocation6], 1 }
 0x207   :  { %1006 = vsyncpa [#allocation9], 1 }
 0x208   :  { %1007 = vsyncpa [#allocation12], 1 }
 0x209   :  { %1008 = vsyncpa [#allocation4], 1 }

</bundles_post_ra>
